<compile_context>
chip_gen: v5e
topology: v5e:2x2
jax: 0.10.0
libtpu: 0.0.40
codegen_flags: <defaults>
</compile_context>

<pallas_src>
import functools

import jax
import jax.numpy as jnp
from jax import lax
from jax.experimental import pallas as pl
from jax.experimental.pallas import tpu as pltpu


IN_FEATURES = 27
H1_FEATURES = 64
H2_FEATURES = 32
OUT_FEATURES = 9


def hal9000_kernel(x_ref, w1_ref, b1_ref, w2_ref, b2_ref, w3_ref, b3_ref, o_ref):
    """One batch tile of the 27->64->32->9 MLP.

    x_ref:  [tile_b, 27]  natural layout (no wrapper transpose of x)
    w*_ref: [out, in]     PyTorch nn.Linear layout, VMEM-resident constants
    b*_ref: [out, 1]
    o_ref:  [9, tile_b]   batch on the 128-lane axis -> lane-dense stores
    """
    x = x_ref[...]  # [tile_b, 27] f32

    # fc1: contract the 27-feature axis of both operands -> [64, tile_b].
    # Keeping the weight as the MXU LHS keeps M tiny ({64,32,9}); batch stays
    # on lanes for all intermediates.
    h1 = lax.dot_general(w1_ref[...], x, (((1,), (1,)), ((), ())),
                         preferred_element_type=jnp.float32)
    h1 = jnp.maximum(h1 + b1_ref[...], 0.0)

    # fc2: [32, 64] @ [64, tile_b] -> [32, tile_b]
    h2 = jnp.dot(w2_ref[...], h1, preferred_element_type=jnp.float32)
    h2 = jnp.maximum(h2 + b2_ref[...], 0.0)

    # output layer: [9, 32] @ [32, tile_b] -> [9, tile_b]  (no activation)
    out = jnp.dot(w3_ref[...], h2, preferred_element_type=jnp.float32)
    o_ref[...] = (out + b3_ref[...]).astype(o_ref.dtype)


def _round_up(n, m):
    return ((n + m - 1) // m) * m


def _choose_tile(batch, target):
    """Pick (tile_b, padded_batch): lane-aligned, overhead-amortised, >=2 grid
    steps for large batches (v7x megacore), minimal padding for small ones."""
    b128 = _round_up(max(batch, 1), 128)
    if b128 <= target:
        return b128, b128                       # one step, pad only to 128
    n_steps = max(2, pl.cdiv(b128, target))     # >=2 so both v7x TCs get work
    tile_b = _round_up(pl.cdiv(b128, n_steps), 128)
    return tile_b, tile_b * n_steps


@functools.partial(jax.jit, static_argnames=("tile_b_target", "transposed_output"))
def hal9000_forward(x, params, *, tile_b_target=8192, transposed_output=False):
    """Forward pass of HAL9000.

    x: [B, 27] float32.
    params: (w1[64,27], b1[64], w2[32,64], b2[32], w3[9,32], b3[9]) in the
            PyTorch nn.Linear layout (weight = [out, in], bias = [out]).
    Returns [B, 9] (or [9, B] if transposed_output=True, which avoids the
    final small transpose pass; columns >= B of that layout are garbage from
    padded rows and are sliced off here).
    """
    w1, b1, w2, b2, w3, b3 = params
    B = x.shape[0]
    assert x.shape[1] == IN_FEATURES

    tile_b, b_pad = _choose_tile(B, tile_b_target)
    if b_pad != B:
        x = jnp.pad(x, ((0, b_pad - B), (0, 0)))

    # Biases as [out, 1] so they broadcast along the lane (batch) axis.
    b1c = b1.reshape(H1_FEATURES, 1)
    b2c = b2.reshape(H2_FEATURES, 1)
    b3c = b3.reshape(OUT_FEATURES, 1)

    # Weights/biases: full-array blocks with constant index_map -> VMEM-resident.
    const = lambda a: pl.BlockSpec(a.shape, lambda i: (0, 0))

    out_t = pl.pallas_call(
        hal9000_kernel,
        out_shape=jax.ShapeDtypeStruct((OUT_FEATURES, b_pad), jnp.float32),
        grid_spec=pl.GridSpec(
            grid=(b_pad // tile_b,),
            in_specs=[
                pl.BlockSpec((tile_b, IN_FEATURES), lambda i: (i, 0)),
                const(w1), const(b1c),
                const(w2), const(b2c),
                const(w3), const(b3c),
            ],
            out_specs=pl.BlockSpec((OUT_FEATURES, tile_b), lambda i: (0, i)),
        ),
        compiler_params=pltpu.CompilerParams(
            dimension_semantics=("parallel",)),  # v7x: shard batch over 2 TCs
    )(x, w1, b1c, w2, b2c, w3, b3c)

    cols = out_t[:, :B] if b_pad != B else out_t
    if transposed_output:
        return cols            # [9, B]
    return cols.T              # [B, 9] (PyTorch layout)


def init_params(key):
    """PyTorch nn.Linear-style params: weight [out, in], bias [out],
    uniform(+-1/sqrt(fan_in)) init."""
    def linear(key, fan_in, fan_out):
        kw, kb = jax.random.split(key)
        bound = 1.0 / jnp.sqrt(fan_in)
        w = jax.random.uniform(kw, (fan_out, fan_in), jnp.float32, -bound, bound)
        b = jax.random.uniform(kb, (fan_out,), jnp.float32, -bound, bound)
        return w, b

    k1, k2, k3 = jax.random.split(key, 3)
    w1, b1 = linear(k1, IN_FEATURES, H1_FEATURES)
    w2, b2 = linear(k2, H1_FEATURES, H2_FEATURES)
    w3, b3 = linear(k3, H2_FEATURES, OUT_FEATURES)
    return (w1, b1, w2, b2, w3, b3)


def reference_forward(x, params):
    w1, b1, w2, b2, w3, b3 = params
    h1 = jnp.maximum(x @ w1.T + b1, 0.0)
    h2 = jnp.maximum(h1 @ w2.T + b2, 0.0)
    return h2 @ w3.T + b3


if __name__ == "__main__":
    key = jax.random.PRNGKey(0)
    kx, kp = jax.random.split(key)

    params = init_params(kp)

    # Small batch of flattened 3x3x3 board encodings (27 features).
    B = 8
    x = jax.random.normal(kx, (B, IN_FEATURES), jnp.float32)
    ref = reference_forward(x, params)

    out = jax.block_until_ready(hal9000_forward(x, params))
    assert out.shape == (B, OUT_FEATURES), out.shape
    assert jnp.allclose(out, ref, atol=1e-5, rtol=1e-5), "mismatch vs reference"

    # Exercise the multi-step grid + padded tail path with a small tile.
    B2 = 300
    x2 = jax.random.normal(kx, (B2, IN_FEATURES), jnp.float32)
    ref2 = reference_forward(x2, params)
    out2 = jax.block_until_ready(hal9000_forward(x2, params, tile_b_target=128))
    assert out2.shape == (B2, OUT_FEATURES), out2.shape
    assert jnp.allclose(out2, ref2, atol=1e-5, rtol=1e-5), "multi-tile mismatch"

    # Transposed-output contract ([9, B]) -- skips the final wrapper transpose.
    out_t = jax.block_until_ready(
        hal9000_forward(x, params, transposed_output=True))
    assert out_t.shape == (OUT_FEATURES, B), out_t.shape
    assert jnp.allclose(out_t.T, ref, atol=1e-5, rtol=1e-5), "transposed mismatch"

    print("KERNEL_OK")
</pallas_src>

<mosaic_0001>
module attributes {stable_mosaic.version = 11 : i64} {
  func.func @hal9000_kernel(%arg0: i32, %arg1: memref<128x27xf32, #tpu.memory_space<vmem>>, %arg2: memref<64x27xf32, #tpu.memory_space<vmem>>, %arg3: memref<64x1xf32, #tpu.memory_space<vmem>>, %arg4: memref<32x64xf32, #tpu.memory_space<vmem>>, %arg5: memref<32x1xf32, #tpu.memory_space<vmem>>, %arg6: memref<9x32xf32, #tpu.memory_space<vmem>>, %arg7: memref<9x1xf32, #tpu.memory_space<vmem>>, %arg8: memref<9x128xf32, #tpu.memory_space<vmem>>) attributes {dimension_semantics = [#tpu.dimension_semantics<parallel>], iteration_bounds = array<i64: 1>, scalar_prefetch = 0 : i64, scratch_operands = 0 : i64, tpu.core_type = #tpu.core_type<tc>, window_params = [{transform_indices = @transform_0, window_bounds = array<i64: 128, 27>}, {pipeline_mode = #tpu.pipeline_mode<synchronous>, transform_indices = @transform_1, window_bounds = array<i64: 64, 27>}, {pipeline_mode = #tpu.pipeline_mode<synchronous>, transform_indices = @transform_2, window_bounds = array<i64: 64, 1>}, {pipeline_mode = #tpu.pipeline_mode<synchronous>, transform_indices = @transform_3, window_bounds = array<i64: 32, 64>}, {pipeline_mode = #tpu.pipeline_mode<synchronous>, transform_indices = @transform_4, window_bounds = array<i64: 32, 1>}, {pipeline_mode = #tpu.pipeline_mode<synchronous>, transform_indices = @transform_5, window_bounds = array<i64: 9, 32>}, {pipeline_mode = #tpu.pipeline_mode<synchronous>, transform_indices = @transform_6, window_bounds = array<i64: 9, 1>}, {transform_indices = @transform_7, window_bounds = array<i64: 9, 128>}]} {
    %c0 = arith.constant 0 : index
    %c0_0 = arith.constant 0 : index
    %0 = vector.load %arg1[%c0, %c0_0] : memref<128x27xf32, #tpu.memory_space<vmem>>, vector<128x27xf32>
    %c0_1 = arith.constant 0 : index
    %c0_2 = arith.constant 0 : index
    %1 = vector.load %arg2[%c0_1, %c0_2] : memref<64x27xf32, #tpu.memory_space<vmem>>, vector<64x27xf32>
    %cst = arith.constant dense<0.000000e+00> : vector<64x128xf32>
    %2 = tpu.matmul %1, %0, %cst {dimension_numbers = #tpu.dot_dimension_numbers<[1], [1], [0], [0], [0, 0, 1, 0], [], []>} : vector<64x27xf32>, vector<128x27xf32>, vector<64x128xf32> -> vector<64x128xf32>
    %c0_3 = arith.constant 0 : index
    %c0_4 = arith.constant 0 : index
    %3 = vector.load %arg3[%c0_3, %c0_4] : memref<64x1xf32, #tpu.memory_space<vmem>>, vector<64x1xf32>
    %4 = vector.broadcast %3 : vector<64x1xf32> to vector<64x128xf32>
    %5 = arith.addf %2, %4 : vector<64x128xf32>
    %cst_5 = arith.constant 0.000000e+00 : f32
    %6 = vector.broadcast %cst_5 : f32 to vector<64x128xf32>
    %7 = arith.maximumf %5, %6 : vector<64x128xf32>
    %c0_6 = arith.constant 0 : index
    %c0_7 = arith.constant 0 : index
    %8 = vector.load %arg4[%c0_6, %c0_7] : memref<32x64xf32, #tpu.memory_space<vmem>>, vector<32x64xf32>
    %cst_8 = arith.constant dense<0.000000e+00> : vector<32x128xf32>
    %9 = tpu.matmul %8, %7, %cst_8 {dimension_numbers = #tpu.dot_dimension_numbers<[1], [0], [0], [1], [0, 0, 1, 1], [], []>} : vector<32x64xf32>, vector<64x128xf32>, vector<32x128xf32> -> vector<32x128xf32>
    %c0_9 = arith.constant 0 : index
    %c0_10 = arith.constant 0 : index
    %10 = vector.load %arg5[%c0_9, %c0_10] : memref<32x1xf32, #tpu.memory_space<vmem>>, vector<32x1xf32>
    %11 = vector.broadcast %10 : vector<32x1xf32> to vector<32x128xf32>
    %12 = arith.addf %9, %11 : vector<32x128xf32>
    %cst_11 = arith.constant 0.000000e+00 : f32
    %13 = vector.broadcast %cst_11 : f32 to vector<32x128xf32>
    %14 = arith.maximumf %12, %13 : vector<32x128xf32>
    %c0_12 = arith.constant 0 : index
    %c0_13 = arith.constant 0 : index
    %15 = vector.load %arg6[%c0_12, %c0_13] : memref<9x32xf32, #tpu.memory_space<vmem>>, vector<9x32xf32>
    %cst_14 = arith.constant dense<0.000000e+00> : vector<9x128xf32>
    %16 = tpu.matmul %15, %14, %cst_14 {dimension_numbers = #tpu.dot_dimension_numbers<[1], [0], [0], [1], [0, 0, 1, 1], [], []>} : vector<9x32xf32>, vector<32x128xf32>, vector<9x128xf32> -> vector<9x128xf32>
    %c0_15 = arith.constant 0 : index
    %c0_16 = arith.constant 0 : index
    %17 = vector.load %arg7[%c0_15, %c0_16] : memref<9x1xf32, #tpu.memory_space<vmem>>, vector<9x1xf32>
    %18 = vector.broadcast %17 : vector<9x1xf32> to vector<9x128xf32>
    %19 = arith.addf %16, %18 : vector<9x128xf32>
    %c0_17 = arith.constant 0 : index
    %c0_18 = arith.constant 0 : index
    %20 = vector.load %arg8[%c0_17, %c0_18] : memref<9x128xf32, #tpu.memory_space<vmem>>, vector<9x128xf32>
    tpu.vector_store %arg8[%c0_17, %c0_18], %19 {strides = array<i32>} : memref<9x128xf32, #tpu.memory_space<vmem>>, vector<9x128xf32>,
    return
  }
  func.func @transform_0(%arg0: i32) -> (i32, i32) {
    %c0_i32 = arith.constant 0 : i32
    %c0_i32_0 = arith.constant 0 : i32
    return %arg0, %c0_i32 : i32, i32
  }
  func.func @transform_1(%arg0: i32) -> (i32, i32) {
    %c0_i32 = arith.constant 0 : i32
    %c0_i32_0 = arith.constant 0 : i32
    %c0_i32_1 = arith.constant 0 : i32
    return %c0_i32, %c0_i32_0 : i32, i32
  }
  func.func @transform_2(%arg0: i32) -> (i32, i32) {
    %c0_i32 = arith.constant 0 : i32
    %c0_i32_0 = arith.constant 0 : i32
    %c0_i32_1 = arith.constant 0 : i32
    return %c0_i32, %c0_i32_0 : i32, i32
  }
  func.func @transform_3(%arg0: i32) -> (i32, i32) {
    %c0_i32 = arith.constant 0 : i32
    %c0_i32_0 = arith.constant 0 : i32
    %c0_i32_1 = arith.constant 0 : i32
    return %c0_i32, %c0_i32_0 : i32, i32
  }
  func.func @transform_4(%arg0: i32) -> (i32, i32) {
    %c0_i32 = arith.constant 0 : i32
    %c0_i32_0 = arith.constant 0 : i32
    %c0_i32_1 = arith.constant 0 : i32
    return %c0_i32, %c0_i32_0 : i32, i32
  }
  func.func @transform_5(%arg0: i32) -> (i32, i32) {
    %c0_i32 = arith.constant 0 : i32
    %c0_i32_0 = arith.constant 0 : i32
    %c0_i32_1 = arith.constant 0 : i32
    return %c0_i32, %c0_i32_0 : i32, i32
  }
  func.func @transform_6(%arg0: i32) -> (i32, i32) {
    %c0_i32 = arith.constant 0 : i32
    %c0_i32_0 = arith.constant 0 : i32
    %c0_i32_1 = arith.constant 0 : i32
    return %c0_i32, %c0_i32_0 : i32, i32
  }
  func.func @transform_7(%arg0: i32) -> (i32, i32) {
    %c0_i32 = arith.constant 0 : i32
    %c0_i32_0 = arith.constant 0 : i32
    return %c0_i32, %arg0 : i32, i32
  }
}

</mosaic_0001>

<bundles_post_ra>
// kernel: hal9000_forward.1
= control target key start
LH: loop header
LB: loop body
LE: loop exit
PB: predicated region body
PF: predicated region fallthrough
CT: control target
= control target key end

     0   :  { %vm98_vm0 = vcmask 220160   ;;  %v394_v9 = vmov 0   ;;  %vm248_vm1 = vcmask 523264   ;;  %vm308_vm2 = vcmask 261120   ;;  %s613_s0 = inlined_call_operand.vmem [shape: f32[128,27], index: 0, kind: input, shape index: {}]   ;;  %s614_s2 = inlined_call_operand.vmem [shape: f32[64,1], index: 2, kind: input, shape index: {}]   ;;  %s615_s1 = inlined_call_operand.vmem [shape: f32[64,27], index: 1, kind: input, shape index: {}]   ;;  %s616_s4 = inlined_call_operand.vmem [shape: f32[32,1], index: 4, kind: input, shape index: {}]   ;;  %s617_s6 = inlined_call_operand.vmem [shape: f32[9,1], index: 6, kind: input, shape index: {}]   ;;  %s618_s3 = inlined_call_operand.vmem [shape: f32[32,64], index: 3, kind: input, shape index: {}]   ;;  %s619_s5 = inlined_call_operand.vmem [shape: f32[9,32], index: 5, kind: input, shape index: {}]   ;;  %s620_s7 = inlined_call_operand.vmem [shape: f32[9,128], index: 7, kind: output, shape index: {}]  }
   0x1   :  { %v41_v0 = vld [vmem:[%s613_s0 + $0x78] sm:$0xff]  ;;  %v40_v1 = vld [vmem:[%s613_s0 + $0x70] sm:$0xff]  ;;  %v39_v2 = vld [vmem:[%s613_s0 + $0x68] sm:$0xff]  ;;  %391 = vset.pattern.permute.xlu0 %v394_v9  ;;  %392 = vset.pattern.permute.xlu1 %v394_v9 }
   0x2   :  { %374 = vmatpush.xpose.msk.msra.mxu3 %vm98_vm0, %v41_v0  ;;  %344 = vmatpush.xpose.msk.msra.mxu0 %vm98_vm0, %v41_v0  ;;  %v38_v3 = vld [vmem:[%s613_s0 + $0x60] sm:$0xff]  ;;  %v37_v4 = vld [vmem:[%s613_s0 + $0x58] sm:$0xff]  ;;  %v36_v5 = vld [vmem:[%s613_s0 + $0x50] sm:$0xff] }
   0x3   :  { %v35_v6 = vld [vmem:[%s613_s0 + $0x48] sm:$0xff]  ;;  %v34_v7 = vld [vmem:[%s613_s0 + $0x40] sm:$0xff]  ;;  %v33_v8 = vld [vmem:[%s613_s0 + $0x38] sm:$0xff]  ;;  %393 = vset.pattern.permute.xlu2 %v394_v9 }
   0x4   :  { %v57_v10 = vld [vmem:[%s614_s2 + $0x38] sm:$0xff]  ;;  %v32_v11 = vld [vmem:[%s613_s0 + $0x30] sm:$0xff]  ;;  %v31_v12 = vld [vmem:[%s613_s0 + $0x28] sm:$0xff] }
   0x5   :  { %95 = vperm.xlu0 %391, %v57_v10   ;;  %v56_v13 = vld [vmem:[%s614_s2 + $0x30] sm:$0xff]  ;;  %v30_v14 = vld [vmem:[%s613_s0 + $0x20] sm:$0xff]  ;;  %v29_v15 = vld [vmem:[%s613_s0 + $0x18] sm:$0xff] }
   0x6   :  { %375 = vmatpush.xpose.msk.msra.mxu3 %vm98_vm0, %v40_v1  ;;  %345 = vmatpush.xpose.msk.msra.mxu0 %vm98_vm0, %v40_v1  ;;  %v51_v16 = vld [vmem:[%s614_s2 + $0x8] sm:$0xff]  ;;  %v28_v17 = vld [vmem:[%s613_s0 + $0x10] sm:$0xff]  ;;  %v26_v20 = vld [vmem:[%s613_s0] sm:$0xff] }
   0x7   :  { %v27_v18 = vld [vmem:[%s613_s0 + $0x8] sm:$0xff]  ;;  %v54_v22 = vld [vmem:[%s614_s2 + $0x20] sm:$0xff]  ;;  %v44_v23 = vld [vmem:[%s615_s1 + $0x10] sm:$0xff] }
   0x8   :  { %v55_v19 = vld [vmem:[%s614_s2 + $0x28] sm:$0xff]  ;;  %v53_v24 = vld [vmem:[%s614_s2 + $0x18] sm:$0xff]  ;;  %v50_v25 = vld [vmem:[%s614_s2] sm:$0xff] }
   0x9   :  { %85 = vperm.xlu1 %392, %v55_v19   ;;  %v43_v21 = vld [vmem:[%s615_s1 + $0x8] sm:$0xff]  ;;  %75 = vperm.xlu2 %393, %v53_v24   ;;  %v45_v26 = vld [vmem:[%s615_s1 + $0x18] sm:$0xff]  ;;  %v52_v27 = vld [vmem:[%s614_s2 + $0x10] sm:$0xff] }
   0xa   :  { %376 = vmatpush.xpose.msk.msra.mxu3 %vm98_vm0, %v39_v2  ;;  %346 = vmatpush.xpose.msk.msra.mxu0 %vm98_vm0, %v39_v2  ;;  %v226_v28 = vld [vmem:[%s616_s4 + $0x10] sm:$0xff]  ;;  %v42_v29 = vld [vmem:[%s615_s1] sm:$0xff]  ;;  %v225_v30 = vld [vmem:[%s616_s4 + $0x8] sm:$0xff] }
   0xb   :  { %v46_v31 = vld [vmem:[%s615_s1 + $0x20] sm:$0xff]  ;;  %v227_v33 = vld [vmem:[%s616_s4 + $0x18] sm:$0xff]  ;;  %v297_v34 = vld [vmem:[%s617_s6 + $0x8] sm:$0x1] }
   0xc   :  { %v296_v32 = vld [vmem:[%s617_s6] sm:$0xff]  ;;  %v47_v35 = vld [vmem:[%s615_s1 + $0x28] sm:$0xff]  ;;  %v48_v37 = vld [vmem:[%s615_s1 + $0x30] sm:$0xff] }
   0xd   :  { %90 = vperm.xlu0 %391, %v56_v13   ;;  %v224_v36 = vld [vmem:[%s616_s4] sm:$0xff]  ;;  %v49_v38 = vld [vmem:[%s615_s1 + $0x38] sm:$0xff]  ;;  %v222_v9 = vld [vmem:[%s618_s3 + $0x10] sm:$0xff] }
   0xe   :  { %377 = vmatpush.xpose.msk.msra.mxu3 %vm98_vm0, %v38_v3  ;;  %347 = vmatpush.xpose.msk.msra.mxu0 %vm98_vm0, %v38_v3  ;;  %v223_v10 = vld [vmem:[%s618_s3 + $0x18] sm:$0xff] }
  0x11   :  { %80 = vperm.xlu1 %392, %v54_v22   ;;  %70 = vperm.xlu2 %393, %v52_v27   ;;  %v294_v27 = vld [vmem:[%s619_s5] sm:$0xff] }
  0x12   :  { %378 = vmatpush.xpose.msk.msra.mxu3 %vm98_vm0, %v37_v4  ;;  %348 = vmatpush.xpose.msk.msra.mxu0 %vm98_vm0, %v37_v4 }
  0x15   :  { %65 = vperm.xlu0 %391, %v51_v16  }
  0x16   :  { %379 = vmatpush.xpose.msk.msra.mxu3 %vm98_vm0, %v36_v5  ;;  %349 = vmatpush.xpose.msk.msra.mxu0 %vm98_vm0, %v36_v5 }
  0x19   :  { %60 = vperm.xlu1 %392, %v50_v25   ;;  %245 = vperm.xlu2 %393, %v227_v33  }
  0x1a   :  { %380 = vmatpush.xpose.msk.msra.mxu3 %vm98_vm0, %v35_v6  ;;  %350 = vmatpush.xpose.msk.msra.mxu0 %vm98_vm0, %v35_v6 }
  0x1d   :  { %240 = vperm.xlu0 %391, %v226_v28   ;;  %v295_v28 = vld [vmem:[%s619_s5 + $0x8] sm:$0x1] }
  0x1e   :  { %381 = vmatpush.xpose.msk.msra.mxu3 %vm98_vm0, %v34_v7  ;;  %351 = vmatpush.xpose.msk.msra.mxu0 %vm98_vm0, %v34_v7  ;;  %v220_v7 = vld [vmem:[%s618_s3] sm:$0xff] }
  0x21   :  { %235 = vperm.xlu1 %392, %v225_v30   ;;  %230 = vperm.xlu2 %393, %v224_v36  }
  0x22   :  { %382 = vmatpush.xpose.msk.msra.mxu3 %vm98_vm0, %v33_v8  ;;  %352 = vmatpush.xpose.msk.msra.mxu0 %vm98_vm0, %v33_v8  ;;  %v221_v8 = vld [vmem:[%s618_s3 + $0x8] sm:$0xff] }
  0x25   :  { %300 = vperm.xlu0 %391, %v296_v32  }
  0x26   :  { %383 = vmatpush.xpose.msk.msra.mxu3 %vm98_vm0, %v32_v11  ;;  %353 = vmatpush.xpose.msk.msra.mxu0 %vm98_vm0, %v32_v11 }
  0x29   :  { %305 = vperm.xlu1 %392, %v297_v34  }
  0x2a   :  { %384 = vmatpush.xpose.msk.msra.mxu3 %vm98_vm0, %v31_v12  ;;  %354 = vmatpush.xpose.msk.msra.mxu0 %vm98_vm0, %v31_v12 }
  0x2e   :  { %385 = vmatpush.xpose.msk.msra.mxu3 %vm98_vm0, %v30_v14  ;;  %355 = vmatpush.xpose.msk.msra.mxu0 %vm98_vm0, %v30_v14 }
  0x32   :  { %386 = vmatpush.xpose.msk.msra.mxu3 %vm98_vm0, %v29_v15  ;;  %356 = vmatpush.xpose.msk.msra.mxu0 %vm98_vm0, %v29_v15 }
  0x36   :  { %387 = vmatpush.xpose.msk.msra.mxu3 %vm98_vm0, %v28_v17  ;;  %357 = vmatpush.xpose.msk.msra.mxu0 %vm98_vm0, %v28_v17 }
  0x3a   :  { %388 = vmatpush.xpose.msk.msra.mxu3 %vm98_vm0, %v27_v18  ;;  %358 = vmatpush.xpose.msk.msra.mxu0 %vm98_vm0, %v27_v18 }
  0x3e   :  { %389 = vmatpush.xpose.msk.msra.mxu3 %vm98_vm0, %v26_v20  ;;  %359 = vmatpush.xpose.msk.msra.mxu0 %vm98_vm0, %v26_v20 }
  0x41   :  { %361 = vmatmul.msk.f32.vlgmr.msra.gmra.mxu3 %vm98_vm0, %v43_v21  ;;  %360 = vmatmul.msk.f32.vlgmr.msra.gmra.mxu0 %vm98_vm0, %v42_v29 }
  0x49   :  { %362 = vmatmul.msk.f32.gmra.mxu3 %vm98_vm0, %v44_v23 }
  0x51   :  { %363 = vmatmul.msk.f32.gmra.mxu3 %vm98_vm0, %v45_v26 }
  0x59   :  { %364 = vmatmul.msk.f32.gmra.mxu3 %vm98_vm0, %v46_v31 }
  0x61   :  { %365 = vmatmul.msk.f32.gmra.mxu3 %vm98_vm0, %v47_v35 }
  0x63   :  { %v76_v47 = vpop.permute.xlu2 %75 }
  0x69   :  { %366 = vmatmul.msk.f32.gmra.mxu3 %vm98_vm0, %v48_v37 }
  0x6b   :  { %v71_v57 = vpop.permute.xlu2 %70 }
  0x71   :  { %367 = vmatmul.msk.f32.gmra.mxu3 %vm98_vm0, %v49_v38 }
  0x73   :  { %v246_v14 = vpop.permute.xlu2 %245 }
  0x77   :  { %v96_v44 = vpop.permute.xlu0 %95 }
  0x7b   :  { %v86_v45 = vpop.permute.xlu1 %85  ;;  %v231_v22 = vpop.permute.xlu2 %230 }
  0x7f   :  { %v91_v48 = vpop.permute.xlu0 %90 }
  0x83   :  { %v81_v52 = vpop.permute.xlu1 %80 }
  0x87   :  { %v66_v60 = vpop.permute.xlu0 %65 }
  0x8b   :  { %v61_v2 = vpop.permute.xlu1 %60 }
  0x8f   :  { %v241_v15 = vpop.permute.xlu0 %240 }
  0x93   :  { %v236_v19 = vpop.permute.xlu1 %235 }
  0x97   :  { %v301_v29 = vpop.permute.xlu0 %300 }
  0x9b   :  { %v306_v32 = vpop.permute.xlu1 %305 }
  0xbe   :  { %v188_v63 = vpop.f32.mrf.mxu0 }
  0xbf   :  { %v189_v4 = vadd.f32 %v188_v63, %v61_v2 }
  0xc1   :  { %v212_v6 = vmax.f32 %v189_v4, 0.0 }
  0xc4   :  { %v191_v39 = vpop.f32.mrf.mxu3 }
  0xc5   :  { %v192_v0 = vadd.f32 %v191_v39, %v66_v60 }
  0xc7   :  { %v213_v5 = vmax.f32 %v192_v0, 0.0 }
  0xcc   :  { %v194_v40 = vpop.f32.mrf.mxu3 }
  0xcd   :  { %v195_v61 = vadd.f32 %v194_v40, %v71_v57 }
  0xcf   :  { %v214_v3 = vmax.f32 %v195_v61, 0.0 }
  0xd4   :  { %v197_v41 = vpop.f32.mrf.mxu3 }
  0xd5   :  { %v198_v58 = vadd.f32 %v197_v41, %v76_v47 }
  0xd7   :  { %v215_v1 = vmax.f32 %v198_v58, 0.0 }
  0xdc   :  { %v200_v42 = vpop.f32.mrf.mxu3 }
  0xdd   :  { %v201_v55 = vadd.f32 %v200_v42, %v81_v52 }
  0xdf   :  { %v216_v62 = vmax.f32 %v201_v55, 0.0 }
  0xe4   :  { %v203_v43 = vpop.f32.mrf.mxu3 }
  0xe5   :  { %v204_v53 = vadd.f32 %v203_v43, %v86_v45 }
  0xe7   :  { %v217_v59 = vmax.f32 %v204_v53, 0.0 }
  0xec   :  { %v206_v46 = vpop.f32.mrf.mxu3 }
  0xed   :  { %v207_v50 = vadd.f32 %v206_v46, %v91_v48 }
  0xef   :  { %v218_v56 = vmax.f32 %v207_v50, 0.0 }
  0xf4   :  { %v209_v49 = vpop.f32.mrf.mxu3 }
  0xf5   :  { %v210_v51 = vadd.f32 %v209_v49, %v96_v44 }
  0xf7   :  { %v219_v54 = vmax.f32 %v210_v51, 0.0 }
  0xf9   :  { %269 = vmatpush.msra.mxu1 %v219_v54 }
  0xfb   :  { %270 = vmatpush.msra.mxu1 %v218_v56 }
  0xfd   :  { %271 = vmatpush.msra.mxu1 %v217_v59 }
  0xff   :  { %272 = vmatpush.msra.mxu1 %v216_v62 }
 0x101   :  { %273 = vmatpush.msra.mxu1 %v215_v1 }
 0x103   :  { %274 = vmatpush.msra.mxu1 %v214_v3 }
 0x105   :  { %275 = vmatpush.msra.mxu1 %v213_v5 }
 0x107   :  { %276 = vmatpush.msra.mxu1 %v212_v6 }
 0x108   :  { %368 = vmatmul.msk.f32.vlgmr.msra.gmra.mxu1 %vm248_vm1, %v220_v7 }
 0x110   :  { %369 = vmatmul.msk.f32.gmra.mxu1 %vm248_vm1, %v221_v8 }
 0x118   :  { %370 = vmatmul.msk.f32.gmra.mxu1 %vm248_vm1, %v222_v9 }
 0x120   :  { %371 = vmatmul.msk.f32.gmra.mxu1 %vm248_vm1, %v223_v10 }
 0x185   :  { %v278_v11 = vpop.f32.mrf.mxu1 }
 0x186   :  { %v279_v23 = vadd.f32 %v278_v11, %v231_v22 }
 0x188   :  { %v290_v26 = vmax.f32 %v279_v23, 0.0 }
 0x18d   :  { %v281_v12 = vpop.f32.mrf.mxu1 }
 0x18e   :  { %v282_v20 = vadd.f32 %v281_v12, %v236_v19 }
 0x190   :  { %v291_v25 = vmax.f32 %v282_v20, 0.0 }
 0x195   :  { %v284_v13 = vpop.f32.mrf.mxu1 }
 0x196   :  { %v285_v17 = vadd.f32 %v284_v13, %v241_v15 }
 0x198   :  { %v292_v24 = vmax.f32 %v285_v17, 0.0 }
 0x19d   :  { %v287_v16 = vpop.f32.mrf.mxu1 }
 0x19e   :  { %v288_v18 = vadd.f32 %v287_v16, %v246_v14 }
 0x1a0   :  { %v293_v21 = vmax.f32 %v288_v18, 0.0 }
 0x1a2   :  { %327 = vmatpush.msra.mxu2 %v293_v21 }
 0x1a4   :  { %328 = vmatpush.msra.mxu2 %v292_v24 }
 0x1a6   :  { %329 = vmatpush.msra.mxu2 %v291_v25 }
 0x1a8   :  { %330 = vmatpush.msra.mxu2 %v290_v26 }
 0x1a9   :  { %372 = vmatmul.msk.f32.vlgmr.msra.gmra.mxu2 %vm308_vm2, %v294_v27 }
 0x1b1   :  { %373 = vmatmul.msk.f32.gmra.mxu2 %vm308_vm2, %v295_v28 }
 0x22c   :  { %v332_v30 = vpop.f32.mrf.mxu2 }
 0x22d   :  { %v333_v31 = vadd.f32 %v332_v30, %v301_v29 }
 0x22f   :  { %338 = vst [vmem:[%s620_s7] sm:$0xff] %v333_v31 }
 0x234   :  { %v335_v33 = vpop.f32.mrf.mxu2 }
 0x235   :  { %v336_v34 = vadd.f32 %v335_v33, %v306_v32 }
 0x237   :  { %339 = vst [vmem:[%s620_s7 + $0x8] sm:$0x1] %v336_v34 }

</bundles_post_ra>
